<compile_context>
chip_gen: v7x
topology: tpu7x:2x2x1
jax: 0.10.0
libtpu: 0.0.40
codegen_flags: <defaults>
</compile_context>

<pallas_src>
import functools
import math

import jax
import jax.numpy as jnp
from jax.experimental import pallas as pl
from jax.experimental.pallas import tpu as pltpu


def _maxpool_same_kernel(x_ref, o_ref, *, kh, kw, sh, sw, Ho, Wo, C):
    """One block of `nb` images per grid step.

    x_ref: (nb, Hk, Wq, sw*C)   padded, W-space-to-depth input (C on lanes)
    o_ref: (nb, Ho, Wo, C)      pooled output
    """
    # ---- W direction: separable window max over the kw taps.
    # Tap j lives at W-block offset j//sw (sublane shift) and lane phase (j%sw)*C,
    # so each tap is a contiguous static slice of the input block.
    row = None
    for j in range(kw):
        b, p = j // sw, j % sw
        tap = x_ref[:, :, b:b + Wo, p * C:(p + 1) * C]      # (nb, Hk, Wo, C)
        row = tap if row is None else jnp.maximum(row, tap)

    # ---- H direction: kh shifted slabs along the leading H axis (unit-stride,
    # leading-dim slices), then keep every sh-th row via a layout-free reshape.
    H2 = Ho * sh
    col = row[:, 0:H2]
    for i in range(1, kh):
        col = jnp.maximum(col, row[:, i:i + H2])            # (nb, H2, Wo, C)

    nb = col.shape[0]
    out = col.reshape(nb, Ho, sh, Wo, C)[:, :, 0]           # (nb, Ho, Wo, C)
    o_ref[...] = out.astype(o_ref.dtype)


def _as_pair(v):
    if isinstance(v, int):
        return (v, v)
    v = tuple(v)
    if len(v) == 1:
        return (v[0], v[0])
    return (v[0], v[1])


def maxpool2d_static_same_padding(x, kernel_size, stride, *, block_bytes=2 << 20):
    """JAX/Pallas equivalent of MaxPool2dStaticSamePadding(kernel_size, stride).

    x: (N, C, H, W) float array.  Returns (N, C, Ho, Wo) with Ho=ceil(H/sh), Wo=ceil(W/sw).
    """
    kh, kw = _as_pair(kernel_size)
    sh, sw = _as_pair(stride)
    N, C, H, W = x.shape

    # Same-padding arithmetic, identical to the PyTorch forward().
    extra_h = (math.ceil(W / sw) - 1) * sw - W + kw
    extra_v = (math.ceil(H / sh) - 1) * sh - H + kh
    # TODO(synk): negative "same" padding (kernel < stride) would crop instead of pad;
    # not needed for the module's real usage (kernel_size >= stride).
    assert extra_h >= 0 and extra_v >= 0
    left = extra_h // 2
    top = extra_v // 2
    Hp, Wp = H + extra_v, W + extra_h
    Ho = (Hp - kh) // sh + 1
    Wo = (Wp - kw) // sw + 1

    # Extra zero rows/cols (never selected by any kept output window) so the kernel
    # can use layout-free reshapes / contiguous slices for the stride subsampling.
    Hk = max(Hp, Ho * sh + kh - 1)
    Wq = max((Wp + sw - 1) // sw, Wo + (kw - 1) // sw)
    Wk = Wq * sw

    # NHWC layout: channels on the lane axis.  Pad value 0.0, same as F.pad.
    xt = jnp.transpose(x, (0, 2, 3, 1))                               # (N, H, W, C)
    xp = jnp.pad(xt, ((0, 0), (top, Hk - H - top), (left, Wk - W - left), (0, 0)))
    # Space-to-depth along W: xk[n, h, wq, p*C + c] == xpad[n, h, wq*sw + p, c]
    xk = xp.reshape(N, Hk, Wq, sw, C).reshape(N, Hk, Wq, sw * C)

    # Batch several images per grid step so each DMA moves ~MiB (per-step overhead
    # is ~0.35us; tiny blocks are pure overhead).  nb must divide N.
    img_bytes = Hk * Wq * sw * C * x.dtype.itemsize
    nb = 1
    for d in range(N, 0, -1):
        if N % d == 0 and d * img_bytes <= block_bytes:
            nb = d
            break

    kern = functools.partial(_maxpool_same_kernel,
                             kh=kh, kw=kw, sh=sh, sw=sw, Ho=Ho, Wo=Wo, C=C)
    flops = N * C * Ho * Wo * kh * kw                    # window compare ops
    bytes_accessed = (N * Hk * Wq * sw * C + N * Ho * Wo * C) * x.dtype.itemsize

    out_nhwc = pl.pallas_call(
        kern,
        out_shape=jax.ShapeDtypeStruct((N, Ho, Wo, C), x.dtype),
        grid=(N // nb,),
        in_specs=[pl.BlockSpec((nb, Hk, Wq, sw * C), lambda b: (b, 0, 0, 0))],
        out_specs=pl.BlockSpec((nb, Ho, Wo, C), lambda b: (b, 0, 0, 0)),
        compiler_params=pltpu.CompilerParams(dimension_semantics=("parallel",)),
        cost_estimate=pl.CostEstimate(flops=flops, transcendentals=0,
                                      bytes_accessed=bytes_accessed),
    )(xk)
    return jnp.transpose(out_nhwc, (0, 3, 1, 2))          # back to NCHW


def _reference(x, kernel_size, stride):
    """Pure-JAX reference replicating the PyTorch forward (pad-with-0 then MaxPool2d)."""
    kh, kw = _as_pair(kernel_size)
    sh, sw = _as_pair(stride)
    N, C, H, W = x.shape
    extra_h = (math.ceil(W / sw) - 1) * sw - W + kw
    extra_v = (math.ceil(H / sh) - 1) * sh - H + kh
    left = extra_h // 2
    right = extra_h - left
    top = extra_v // 2
    bottom = extra_v - top
    xp = jnp.pad(x, ((0, 0), (0, 0), (top, bottom), (left, right)))
    return jax.lax.reduce_window(
        xp, -jnp.inf, jax.lax.max,
        window_dimensions=(1, 1, kh, kw),
        window_strides=(1, 1, sh, sw),
        padding="VALID",
    )


if __name__ == "__main__":
    # Module config as used in MFPNet / EfficientDet: MaxPool2dStaticSamePadding(3, 2)
    KERNEL_SIZE = 3
    STRIDE = 2

    key = jax.random.PRNGKey(0)
    x = jax.random.normal(key, (2, 4, 16, 16), dtype=jnp.float32)

    out = maxpool2d_static_same_padding(x, KERNEL_SIZE, STRIDE)
    out = jax.block_until_ready(out)

    ref = _reference(x, KERNEL_SIZE, STRIDE)
    assert out.shape == ref.shape == (2, 4, 8, 8), (out.shape, ref.shape)
    assert jnp.allclose(out, ref), float(jnp.max(jnp.abs(out - ref)))

    print("KERNEL_OK")
</pallas_src>

<mosaic_0001>
module attributes {stable_mosaic.version = 11 : i64} {
  func.func @_maxpool_same_kernel(%arg0: i32, %arg1: memref<2x18x9x8xf32, #tpu.memory_space<vmem>>, %arg2: memref<2x8x8x4xf32, #tpu.memory_space<vmem>>) attributes {dimension_semantics = [#tpu.dimension_semantics<parallel>], iteration_bounds = array<i64: 1>, scalar_prefetch = 0 : i64, scratch_operands = 0 : i64, tpu.core_type = #tpu.core_type<tc>, window_params = [{transform_indices = @transform_0, window_bounds = array<i64: 2, 18, 9, 8>}, {transform_indices = @transform_1, window_bounds = array<i64: 2, 8, 8, 4>}]} {
    %c0 = arith.constant 0 : index
    %c0_0 = arith.constant 0 : index
    %c0_1 = arith.constant 0 : index
    %c0_2 = arith.constant 0 : index
    %0 = vector.load %arg1[%c0, %c0_0, %c0_1, %c0_2] : memref<2x18x9x8xf32, #tpu.memory_space<vmem>>, vector<2x18x8x4xf32>
    %c0_3 = arith.constant 0 : index
    %c0_4 = arith.constant 0 : index
    %c0_5 = arith.constant 0 : index
    %c4 = arith.constant 4 : index
    %1 = vector.load %arg1[%c0_3, %c0_4, %c0_5, %c4] : memref<2x18x9x8xf32, #tpu.memory_space<vmem>>, vector<2x18x8x4xf32>
    %2 = arith.maximumf %0, %1 : vector<2x18x8x4xf32>
    %c0_6 = arith.constant 0 : index
    %c0_7 = arith.constant 0 : index
    %c1 = arith.constant 1 : index
    %c0_8 = arith.constant 0 : index
    %3 = vector.load %arg1[%c0_6, %c0_7, %c1, %c0_8] : memref<2x18x9x8xf32, #tpu.memory_space<vmem>>, vector<2x18x8x4xf32>
    %4 = arith.maximumf %2, %3 : vector<2x18x8x4xf32>
    %5 = vector.extract_strided_slice %4 {offsets = [0, 0, 0, 0], sizes = [2, 16, 8, 4], strides = [1, 1, 1, 1]} : vector<2x18x8x4xf32> to vector<2x16x8x4xf32>
    %6 = vector.extract_strided_slice %4 {offsets = [0, 1, 0, 0], sizes = [2, 16, 8, 4], strides = [1, 1, 1, 1]} : vector<2x18x8x4xf32> to vector<2x16x8x4xf32>
    %7 = arith.maximumf %5, %6 : vector<2x16x8x4xf32>
    %8 = vector.extract_strided_slice %4 {offsets = [0, 2, 0, 0], sizes = [2, 16, 8, 4], strides = [1, 1, 1, 1]} : vector<2x18x8x4xf32> to vector<2x16x8x4xf32>
    %9 = arith.maximumf %7, %8 : vector<2x16x8x4xf32>
    %10 = vector.shape_cast %9 : vector<2x16x8x4xf32> to vector<2x8x2x8x4xf32>
    %11 = vector.extract_strided_slice %10 {offsets = [0, 0, 0, 0, 0], sizes = [2, 8, 1, 8, 4], strides = [1, 1, 1, 1, 1]} : vector<2x8x2x8x4xf32> to vector<2x8x1x8x4xf32>
    %12 = vector.shape_cast %11 : vector<2x8x1x8x4xf32> to vector<2x8x8x4xf32>
    %c0_9 = arith.constant 0 : index
    %c0_10 = arith.constant 0 : index
    %c0_11 = arith.constant 0 : index
    %c0_12 = arith.constant 0 : index
    %13 = vector.load %arg2[%c0_9, %c0_10, %c0_11, %c0_12] : memref<2x8x8x4xf32, #tpu.memory_space<vmem>>, vector<2x8x8x4xf32>
    tpu.vector_store %arg2[%c0_9, %c0_10, %c0_11, %c0_12], %12 {strides = array<i32>} : memref<2x8x8x4xf32, #tpu.memory_space<vmem>>, vector<2x8x8x4xf32>,
    return
  }
  func.func @transform_0(%arg0: i32) -> (i32, i32, i32, i32) {
    %c0_i32 = arith.constant 0 : i32
    %c0_i32_0 = arith.constant 0 : i32
    %c0_i32_1 = arith.constant 0 : i32
    %c0_i32_2 = arith.constant 0 : i32
    return %arg0, %c0_i32, %c0_i32_0, %c0_i32_1 : i32, i32, i32, i32
  }
  func.func @transform_1(%arg0: i32) -> (i32, i32, i32, i32) {
    %c0_i32 = arith.constant 0 : i32
    %c0_i32_0 = arith.constant 0 : i32
    %c0_i32_1 = arith.constant 0 : i32
    %c0_i32_2 = arith.constant 0 : i32
    return %arg0, %c0_i32, %c0_i32_0, %c0_i32_1 : i32, i32, i32, i32
  }
}

</mosaic_0001>

<bundles_post_ra>
// kernel: tpu_custom_call.1
= control target key start
LH: loop header
LB: loop body
LE: loop exit
PB: predicated region body
PF: predicated region fallthrough
CT: control target
= control target key end

     0   :  { %s334_s10 = smov 124   ;;  %vm312_vm0 = vcmask 31744   ;;  %s790_s0 = inlined_call_operand.vmem [shape: f32[2,18,9,8], index: 0, kind: input, shape index: {}]   ;;  %s791_s1 = inlined_call_operand.vmem [shape: f32[2,8,8,4], index: 1, kind: output, shape index: {}]  }
   0x1   :  { %v348_v0 = vld [vmem:[%s790_s0 + $0x20] sm:$0xff]  ;;  %v362_v2 = vld [vmem:[%s790_s0 + $0x30] sm:$0xff] }
   0x2   :  { %v353_v1 = vld [vmem:[%s790_s0] sm:$0xff]  ;;  %80 = vrot.lane.b32.xlu1 %v348_v0, %s334_s10  ;;  %v367_v3 = vld [vmem:[%s790_s0 + $0x10] sm:$0xff] }
   0x3   :  { %76 = vrot.lane.b32.xlu0 %v353_v1, %s334_s10  ;;  %v376_v4 = vld [vmem:[%s790_s0 + $0x50] sm:$0xff]  ;;  %v381_v5 = vld [vmem:[%s790_s0 + $0x40] sm:$0xff] }
   0x4   :  { %v390_v6 = vld [vmem:[%s790_s0 + $0x70] sm:$0xff]  ;;  %v395_v7 = vld [vmem:[%s790_s0 + $0x60] sm:$0xff] }
   0x5   :  { %v404_v8 = vld [vmem:[%s790_s0 + $0x90] sm:$0xff]  ;;  %v409_v9 = vld [vmem:[%s790_s0 + $0x80] sm:$0xff] }
   0x6   :  { %82 = vrot.lane.b32.xlu1 %v362_v2, %s334_s10  ;;  %v418_v10 = vld [vmem:[%s790_s0 + $0xb0] sm:$0xff]  ;;  %v423_v11 = vld [vmem:[%s790_s0 + $0xa0] sm:$0xff] }
   0x7   :  { %78 = vrot.lane.b32.xlu0 %v367_v3, %s334_s10  ;;  %v432_v12 = vld [vmem:[%s790_s0 + $0xd0] sm:$0xff]  ;;  %v437_v13 = vld [vmem:[%s790_s0 + $0xc0] sm:$0xff] }
   0x8   :  { %v446_v14 = vld [vmem:[%s790_s0 + $0xf0] sm:$0xff]  ;;  %v451_v15 = vld [vmem:[%s790_s0 + $0xe0] sm:$0xff] }
   0x9   :  { %v460_v16 = vld [vmem:[%s790_s0 + $0x130] sm:$0xff]  ;;  %v465_v17 = vld [vmem:[%s790_s0 + $0x120] sm:$0xff] }
   0xa   :  { %86 = vrot.lane.b32.xlu1 %v376_v4, %s334_s10  ;;  %v474_v18 = vld [vmem:[%s790_s0 + $0x150] sm:$0xff]  ;;  %v479_v19 = vld [vmem:[%s790_s0 + $0x140] sm:$0xff] }
   0xb   :  { %84 = vrot.lane.b32.xlu0 %v381_v5, %s334_s10  ;;  %v488_v20 = vld [vmem:[%s790_s0 + $0x170] sm:$0xff]  ;;  %v493_v21 = vld [vmem:[%s790_s0 + $0x160] sm:$0xff] }
   0xc   :  { %v502_v22 = vld [vmem:[%s790_s0 + $0x190] sm:$0xff]  ;;  %v507_v23 = vld [vmem:[%s790_s0 + $0x180] sm:$0xff] }
   0xd   :  { %v516_v24 = vld [vmem:[%s790_s0 + $0x1b0] sm:$0xff]  ;;  %v521_v25 = vld [vmem:[%s790_s0 + $0x1a0] sm:$0xff] }
   0xe   :  { %90 = vrot.lane.b32.xlu1 %v390_v6, %s334_s10  ;;  %v530_v26 = vld [vmem:[%s790_s0 + $0x1d0] sm:$0xff]  ;;  %v535_v27 = vld [vmem:[%s790_s0 + $0x1c0] sm:$0xff] }
   0xf   :  { %88 = vrot.lane.b32.xlu0 %v395_v7, %s334_s10  ;;  %v544_v28 = vld [vmem:[%s790_s0 + $0x1f0] sm:$0xff]  ;;  %v549_v29 = vld [vmem:[%s790_s0 + $0x1e0] sm:$0xff] }
  0x10   :  { %v558_v30 = vld [vmem:[%s790_s0 + $0x210] sm:$0xff]  ;;  %v563_v31 = vld [vmem:[%s790_s0 + $0x200] sm:$0xff] }
  0x11   :  { %v572_v32 = vld [vmem:[%s790_s0 + $0x220] sm:$0xff]  ;;  %v215_v38 = vld [vmem:[%s790_s0 + $0x31] sm:$0xff] }
  0x12   :  { %94 = vrot.lane.b32.xlu1 %v404_v8, %s334_s10  ;;  %v577_v33 = vld [vmem:[%s790_s0 + $0x100] sm:$0xff]  ;;  %v213_v40 = vld [vmem:[%s790_s0 + $0x11] sm:$0xff] }
  0x13   :  { %92 = vrot.lane.b32.xlu0 %v409_v9, %s334_s10  ;;  %v212_v37 = vld [vmem:[%s790_s0 + $0x1] sm:$0xff]  ;;  %v217_v49 = vld [vmem:[%s790_s0 + $0x51] sm:$0xff] }
  0x14   :  { %v214_v45 = vld [vmem:[%s790_s0 + $0x21] sm:$0xff]  ;;  %v219_v61 = vld [vmem:[%s790_s0 + $0x71] sm:$0xff] }
  0x15   :  { %v216_v51 = vld [vmem:[%s790_s0 + $0x41] sm:$0xff] }
  0x16   :  { %98 = vrot.lane.b32.xlu1 %v418_v10, %s334_s10  ;;  %v218_v63 = vld [vmem:[%s790_s0 + $0x61] sm:$0xff] }
  0x17   :  { %96 = vrot.lane.b32.xlu0 %v423_v11, %s334_s10 }
  0x1a   :  { %102 = vrot.lane.b32.xlu1 %v432_v12, %s334_s10 }
  0x1b   :  { %100 = vrot.lane.b32.xlu0 %v437_v13, %s334_s10 }
  0x1e   :  { %106 = vrot.lane.b32.xlu1 %v446_v14, %s334_s10 }
  0x1f   :  { %104 = vrot.lane.b32.xlu0 %v451_v15, %s334_s10 }
  0x22   :  { %112 = vrot.lane.b32.xlu1 %v460_v16, %s334_s10 }
  0x23   :  { %110 = vrot.lane.b32.xlu0 %v465_v17, %s334_s10 }
  0x26   :  { %116 = vrot.lane.b32.xlu1 %v474_v18, %s334_s10 }
  0x27   :  { %114 = vrot.lane.b32.xlu0 %v479_v19, %s334_s10 }
  0x2a   :  { %120 = vrot.lane.b32.xlu1 %v488_v20, %s334_s10 }
  0x2b   :  { %118 = vrot.lane.b32.xlu0 %v493_v21, %s334_s10 }
  0x2e   :  { %124 = vrot.lane.b32.xlu1 %v502_v22, %s334_s10 }
  0x2f   :  { %122 = vrot.lane.b32.xlu0 %v507_v23, %s334_s10 }
  0x32   :  { %128 = vrot.lane.b32.xlu1 %v516_v24, %s334_s10 }
  0x33   :  { %126 = vrot.lane.b32.xlu0 %v521_v25, %s334_s10 }
  0x36   :  { %132 = vrot.lane.b32.xlu1 %v530_v26, %s334_s10 }
  0x37   :  { %130 = vrot.lane.b32.xlu0 %v535_v27, %s334_s10 }
  0x3a   :  { %136 = vrot.lane.b32.xlu1 %v544_v28, %s334_s10 }
  0x3b   :  { %134 = vrot.lane.b32.xlu0 %v549_v29, %s334_s10 }
  0x3e   :  { %140 = vrot.lane.b32.xlu1 %v558_v30, %s334_s10 }
  0x3f   :  { %138 = vrot.lane.b32.xlu0 %v563_v31, %s334_s10 }
  0x42   :  { %142 = vrot.lane.b32.xlu1 %v572_v32, %s334_s10 }
  0x43   :  { %108 = vrot.lane.b32.xlu0 %v577_v33, %s334_s10 }
  0x74   :  { %v81_v34 = vpop.permute.xlu1 %80 }
  0x75   :  { %v77_v35 = vpop.permute.xlu0 %76  ;;  %v180_v42 = vmax.f32 %v348_v0, %v81_v34 }
  0x76   :  { %v178_v36 = vmax.f32 %v353_v1, %v77_v35  ;;  %v221_v35 = vld [vmem:[%s790_s0 + $0x91] sm:$0xff] }
  0x77   :  { %v248_v53 = vmax.f32 %v180_v42, %v214_v45  ;;  %v222_v45 = vld [vmem:[%s790_s0 + $0xa1] sm:$0xff] }
  0x78   :  { %v83_v39 = vpop.permute.xlu1 %82  ;;  %v246_v46 = vmax.f32 %v178_v36, %v212_v37  ;;  %v220_v37 = vld [vmem:[%s790_s0 + $0x81] sm:$0xff] }
  0x79   :  { %v79_v41 = vpop.permute.xlu0 %78  ;;  %v181_v43 = vmax.f32 %v362_v2, %v83_v39 }
  0x7a   :  { %v179_v44 = vmax.f32 %v367_v3, %v79_v41 }
  0x7b   :  { %v249_v47 = vmax.f32 %v181_v43, %v215_v38  ;;  %v223_v43 = vld [vmem:[%s790_s0 + $0xb1] sm:$0xff] }
  0x7c   :  { %v247_v48 = vmax.f32 %v179_v44, %v213_v40  ;;  %v87_v50 = vpop.permute.xlu1 %86 }
  0x7d   :  { %v85_v52 = vpop.permute.xlu0 %84  ;;  %v183_v55 = vmax.f32 %v376_v4, %v87_v50  ;;  %v281_v57 = vmax.f32 %v248_v53, %v249_v47 }
  0x7e   :  { %v280_v54 = vmax.f32 %v246_v46, %v247_v48  ;;  %v182_v56 = vmax.f32 %v381_v5, %v85_v52 }
  0x7f   :  { %v251_v59 = vmax.f32 %v183_v55, %v217_v49 }
  0x80   :  { %v296_v58 = vmax.f32 %v280_v54, %v248_v53  ;;  %v250_v60 = vmax.f32 %v182_v56, %v216_v51  ;;  %v91_v62 = vpop.permute.xlu1 %90  ;;  %v225_v51 = vld [vmem:[%s790_s0 + $0xd1] sm:$0xff]  ;;  %v224_v53 = vld [vmem:[%s790_s0 + $0xc1] sm:$0xff] }
  0x81   :  { %v89_v0 = vpop.permute.xlu0 %88  ;;  %v185_v2 = vmax.f32 %v390_v6, %v91_v62 }
  0x82   :  { %313 = vst.msk [vmem:[%s791_s1] sm:$0xff] %vm312_vm0, %v296_v58  ;;  %v297_v1 = vmax.f32 %v281_v57, %v250_v60  ;;  %v184_v3 = vmax.f32 %v395_v7, %v89_v0  ;;  %v282_v4 = vmax.f32 %v250_v60, %v251_v59  ;;  %v226_v60 = vld [vmem:[%s790_s0 + $0xe1] sm:$0xff]  ;;  %v230_v0 = vld [vmem:[%s790_s0 + $0x131] sm:$0xff] }
  0x83   :  { %v253_v5 = vmax.f32 %v185_v2, %v219_v61  ;;  %v229_v2 = vld [vmem:[%s790_s0 + $0x121] sm:$0xff] }
  0x84   :  { %314 = vst.msk [vmem:[%s791_s1 + $0x8] sm:$0xff] %vm312_vm0, %v297_v1  ;;  %v252_v34 = vmax.f32 %v184_v3, %v218_v63  ;;  %v95_v36 = vpop.permute.xlu1 %94 }
  0x85   :  { %v93_v6 = vpop.permute.xlu0 %92  ;;  %v187_v7 = vmax.f32 %v404_v8, %v95_v36  ;;  %v232_v36 = vld [vmem:[%s790_s0 + $0x151] sm:$0xff] }
  0x86   :  { %v298_v38 = vmax.f32 %v282_v4, %v252_v34  ;;  %v186_v39 = vmax.f32 %v409_v9, %v93_v6  ;;  %v283_v40 = vmax.f32 %v252_v34, %v253_v5  ;;  %v231_v6 = vld [vmem:[%s790_s0 + $0x141] sm:$0xff] }
  0x87   :  { %v255_v41 = vmax.f32 %v187_v7, %v221_v35 }
  0x88   :  { %315 = vst.msk [vmem:[%s791_s1 + $0x10] sm:$0xff] %vm312_vm0, %v298_v38  ;;  %v254_v42 = vmax.f32 %v186_v39, %v220_v37  ;;  %v99_v44 = vpop.permute.xlu1 %98 }
  0x89   :  { %v97_v8 = vpop.permute.xlu0 %96  ;;  %v189_v9 = vmax.f32 %v418_v10, %v99_v44 }
  0x8a   :  { %v299_v46 = vmax.f32 %v283_v40, %v254_v42  ;;  %v188_v47 = vmax.f32 %v423_v11, %v97_v8  ;;  %v284_v48 = vmax.f32 %v254_v42, %v255_v41  ;;  %v234_v41 = vld [vmem:[%s790_s0 + $0x171] sm:$0xff] }
  0x8b   :  { %v257_v49 = vmax.f32 %v189_v9, %v223_v43  ;;  %v233_v43 = vld [vmem:[%s790_s0 + $0x161] sm:$0xff] }
  0x8c   :  { %316 = vst.msk [vmem:[%s791_s1 + $0x18] sm:$0xff] %vm312_vm0, %v299_v46  ;;  %v256_v50 = vmax.f32 %v188_v47, %v222_v45  ;;  %v103_v52 = vpop.permute.xlu1 %102  ;;  %v236_v47 = vld [vmem:[%s790_s0 + $0x191] sm:$0xff] }
  0x8d   :  { %v101_v10 = vpop.permute.xlu0 %100  ;;  %v191_v11 = vmax.f32 %v432_v12, %v103_v52 }
  0x8e   :  { %v300_v54 = vmax.f32 %v284_v48, %v256_v50  ;;  %v190_v55 = vmax.f32 %v437_v13, %v101_v10  ;;  %v285_v56 = vmax.f32 %v256_v50, %v257_v49  ;;  %v235_v49 = vld [vmem:[%s790_s0 + $0x181] sm:$0xff] }
  0x8f   :  { %v259_v57 = vmax.f32 %v191_v11, %v225_v51 }
  0x90   :  { %317 = vst.msk [vmem:[%s791_s1 + $0x20] sm:$0xff] %vm312_vm0, %v300_v54  ;;  %v258_v58 = vmax.f32 %v190_v55, %v224_v53  ;;  %v659_v59 = vpop.permute.xlu1 %106  ;;  %v238_v54 = vld [vmem:[%s790_s0 + $0x1b1] sm:$0xff]  ;;  %v237_v55 = vld [vmem:[%s790_s0 + $0x1a1] sm:$0xff] }
  0x91   :  { %v105_v61 = vpop.permute.xlu0 %104 }
  0x92   :  { %v301_v62 = vmax.f32 %v285_v56, %v258_v58  ;;  %v192_v12 = vmax.f32 %v451_v15, %v105_v61  ;;  %v286_v63 = vmax.f32 %v258_v58, %v259_v57 }
  0x94   :  { %318 = vst.msk [vmem:[%s791_s1 + $0x28] sm:$0xff] %vm312_vm0, %v301_v62  ;;  %v669_v13 = vmax.f32 %v192_v12, %v226_v60  ;;  %v113_v1 = vpop.permute.xlu1 %112  ;;  %v240_v62 = vld [vmem:[%s790_s0 + $0x1d1] sm:$0xff] }
  0x95   :  { %v111_v3 = vpop.permute.xlu0 %110  ;;  %v196_v4 = vmax.f32 %v460_v16, %v113_v1 }
  0x96   :  { %v302_v15 = vmax.f32 %v286_v63, %v669_v13  ;;  %v195_v5 = vmax.f32 %v465_v17, %v111_v3  ;;  %v239_v63 = vld [vmem:[%s790_s0 + $0x1c1] sm:$0xff] }
  0x97   :  { %v264_v34 = vmax.f32 %v196_v4, %v230_v0  ;;  %v242_v4 = vld [vmem:[%s790_s0 + $0x1f1] sm:$0xff] }
  0x98   :  { %319 = vst.msk [vmem:[%s791_s1 + $0x30] sm:$0xff] %vm312_vm0, %v302_v15  ;;  %v263_v35 = vmax.f32 %v195_v5, %v229_v2  ;;  %v117_v37 = vpop.permute.xlu1 %116 }
  0x99   :  { %v115_v38 = vpop.permute.xlu0 %114  ;;  %v198_v16 = vmax.f32 %v474_v18, %v117_v37  ;;  %v193_v37 = vmax.f32 %v446_v14, %v659_v59  ;;  %v243_v14 = vld [vmem:[%s790_s0 + $0x201] sm:$0xff] }
  0x9a   :  { %v197_v17 = vmax.f32 %v479_v19, %v115_v38  ;;  %v288_v7 = vmax.f32 %v263_v35, %v264_v34  ;;  %v241_v34 = vld [vmem:[%s790_s0 + $0x1e1] sm:$0xff] }
  0x9b   :  { %v266_v39 = vmax.f32 %v198_v16, %v232_v36 }
  0x9c   :  { %v265_v40 = vmax.f32 %v197_v17, %v231_v6  ;;  %v121_v42 = vpop.permute.xlu1 %120  ;;  %v227_v17 = vld [vmem:[%s790_s0 + $0xf1] sm:$0xff] }
  0x9d   :  { %v119_v44 = vpop.permute.xlu0 %118  ;;  %v200_v8 = vmax.f32 %v488_v20, %v121_v42 }
  0x9e   :  { %v304_v45 = vmax.f32 %v288_v7, %v265_v40  ;;  %v199_v18 = vmax.f32 %v493_v21, %v119_v44  ;;  %v289_v46 = vmax.f32 %v265_v40, %v266_v39 }
  0x9f   :  { %v268_v19 = vmax.f32 %v200_v8, %v234_v41  ;;  %v261_v41 = vmax.f32 %v193_v37, %v227_v17 }
  0xa0   :  { %321 = vst.msk [vmem:[%s791_s1 + $0x40] sm:$0xff] %vm312_vm0, %v304_v45  ;;  %v267_v9 = vmax.f32 %v199_v18, %v233_v43  ;;  %v125_v48 = vpop.permute.xlu1 %124  ;;  %v245_v45 = vld [vmem:[%s790_s0 + $0x221] sm:$0xff] }
  0xa1   :  { %v123_v20 = vpop.permute.xlu0 %122  ;;  %v202_v21 = vmax.f32 %v502_v22, %v125_v48 }
  0xa2   :  { %v305_v50 = vmax.f32 %v289_v46, %v267_v9  ;;  %v201_v51 = vmax.f32 %v507_v23, %v123_v20  ;;  %v290_v52 = vmax.f32 %v267_v9, %v268_v19  ;;  %v287_v9 = vmax.f32 %v669_v13, %v261_v41 }
  0xa3   :  { %v270_v53 = vmax.f32 %v202_v21, %v236_v47 }
  0xa4   :  { %322 = vst.msk [vmem:[%s791_s1 + $0x48] sm:$0xff] %vm312_vm0, %v305_v50  ;;  %v269_v10 = vmax.f32 %v201_v51, %v235_v49  ;;  %v129_v11 = vpop.permute.xlu1 %128 }
  0xa5   :  { %v127_v22 = vpop.permute.xlu0 %126  ;;  %v204_v23 = vmax.f32 %v516_v24, %v129_v11 }
  0xa6   :  { %v306_v56 = vmax.f32 %v290_v52, %v269_v10  ;;  %v203_v57 = vmax.f32 %v521_v25, %v127_v22  ;;  %v291_v58 = vmax.f32 %v269_v10, %v270_v53 }
  0xa7   :  { %v272_v60 = vmax.f32 %v204_v23, %v238_v54 }
  0xa8   :  { %323 = vst.msk [vmem:[%s791_s1 + $0x50] sm:$0xff] %vm312_vm0, %v306_v56  ;;  %v271_v61 = vmax.f32 %v203_v57, %v237_v55  ;;  %v133_v12 = vpop.permute.xlu1 %132 }
  0xa9   :  { %v131_v24 = vpop.permute.xlu0 %130  ;;  %v206_v25 = vmax.f32 %v530_v26, %v133_v12 }
  0xaa   :  { %v307_v0 = vmax.f32 %v291_v58, %v271_v61  ;;  %v205_v1 = vmax.f32 %v535_v27, %v131_v24  ;;  %v292_v2 = vmax.f32 %v271_v61, %v272_v60 }
  0xab   :  { %v274_v3 = vmax.f32 %v206_v25, %v240_v62 }
  0xac   :  { %324 = vst.msk [vmem:[%s791_s1 + $0x58] sm:$0xff] %vm312_vm0, %v307_v0  ;;  %v273_v15 = vmax.f32 %v205_v1, %v239_v63  ;;  %v137_v5 = vpop.permute.xlu1 %136 }
  0xad   :  { %v135_v26 = vpop.permute.xlu0 %134  ;;  %v208_v27 = vmax.f32 %v544_v28, %v137_v5  ;;  %v244_v28 = vld [vmem:[%s790_s0 + $0x211] sm:$0xff] }
  0xae   :  { %v308_v35 = vmax.f32 %v292_v2, %v273_v15  ;;  %v207_v36 = vmax.f32 %v549_v29, %v135_v26  ;;  %v293_v6 = vmax.f32 %v273_v15, %v274_v3 }
  0xaf   :  { %v276_v38 = vmax.f32 %v208_v27, %v242_v4 }
  0xb0   :  { %325 = vst.msk [vmem:[%s791_s1 + $0x60] sm:$0xff] %vm312_vm0, %v308_v35  ;;  %v275_v16 = vmax.f32 %v207_v36, %v241_v34  ;;  %v141_v29 = vpop.permute.xlu1 %140 }
  0xb1   :  { %v139_v59 = vpop.permute.xlu0 %138  ;;  %v210_v39 = vmax.f32 %v558_v30, %v141_v29  ;;  %v228_v30 = vld [vmem:[%s790_s0 + $0x101] sm:$0xff] }
  0xb2   :  { %v309_v7 = vmax.f32 %v293_v6, %v275_v16  ;;  %v209_v40 = vmax.f32 %v563_v31, %v139_v59  ;;  %v294_v42 = vmax.f32 %v275_v16, %v276_v38 }
  0xb3   :  { %v278_v43 = vmax.f32 %v210_v39, %v244_v28 }
  0xb4   :  { %326 = vst.msk [vmem:[%s791_s1 + $0x68] sm:$0xff] %vm312_vm0, %v309_v7  ;;  %v277_v44 = vmax.f32 %v209_v40, %v243_v14  ;;  %v143_v8 = vpop.permute.xlu1 %142 }
  0xb5   :  { %v109_v18 = vpop.permute.xlu0 %108  ;;  %v211_v46 = vmax.f32 %v572_v32, %v143_v8 }
  0xb6   :  { %v310_v31 = vmax.f32 %v294_v42, %v277_v44  ;;  %v194_v19 = vmax.f32 %v577_v33, %v109_v18  ;;  %v295_v47 = vmax.f32 %v277_v44, %v278_v43 }
  0xb7   :  { %v279_v48 = vmax.f32 %v211_v46, %v245_v45 }
  0xb8   :  { %327 = vst.msk [vmem:[%s791_s1 + $0x70] sm:$0xff] %vm312_vm0, %v310_v31  ;;  %v262_v49 = vmax.f32 %v194_v19, %v228_v30 }
  0xb9   :  { %v311_v20 = vmax.f32 %v295_v47, %v279_v48 }
  0xba   :  { %v303_v50 = vmax.f32 %v287_v9, %v262_v49 }
  0xbb   :  { %328 = vst.msk [vmem:[%s791_s1 + $0x78] sm:$0xff] %vm312_vm0, %v311_v20 }
  0xbc   :  { %320 = vst.msk [vmem:[%s791_s1 + $0x38] sm:$0xff] %vm312_vm0, %v303_v50 }

</bundles_post_ra>
